<compile_context>
chip_gen: v7x
topology: tpu7x:2x2x1
jax: 0.10.0
libtpu: 0.0.40
codegen_flags: <defaults>
</compile_context>

<pallas_src>
import functools

import jax
import jax.numpy as jnp
from jax.experimental import pallas as pl
from jax.experimental.pallas import tpu as pltpu

LN_EPS = 1e-5  # torch.nn.LayerNorm default


def _round_up(x, m):
    return (x + m - 1) // m * m


def _layer_norm(x, gamma, beta, lane_mask, h_real):
    """Two-pass LayerNorm over the last dim with a real-lane mask.

    x's padded lanes are exactly zero, so sum(x) over the padded width equals
    the sum over the real width; masking (x - mu) keeps the variance exact and
    zero-padded gamma/beta keep the padded output lanes at exactly 0.
    """
    inv_h = 1.0 / float(h_real)
    mu = jnp.sum(x, axis=-1, keepdims=True) * inv_h
    d = (x - mu) * lane_mask
    var = jnp.sum(d * d, axis=-1, keepdims=True) * inv_h
    return d * jax.lax.rsqrt(var + LN_EPS) * gamma + beta


def _fused_gcn_kernel(x_hbm, adj_ref, wlin_ref, blin_ref, wg_ref, bg_ref,
                      gff_ref, bff_ref, gln_ref, bln_ref,
                      out_ref, ff_ref, ffb_ref, acc_ref, sem,
                      *, h_real, hp, tm, tk, n_row_tiles):
    l = pl.program_id(0)   # layer index   (outer,  "arbitrary")
    j = pl.program_id(1)   # dst node tile (middle, "arbitrary")
    k = pl.program_id(2)   # src node tile (inner reduction axis, last)
    bf16 = jnp.bfloat16

    lane = jax.lax.broadcasted_iota(jnp.int32, (1, hp), 1)
    lane_mask = (lane < h_real).astype(jnp.float32)

    # --- first grid step: one manual DMA of the initial features HBM -> the
    # resident output buffer (x never occupies VMEM as a pipelined input).
    @pl.when((l == 0) & (j == 0) & (k == 0))
    def _():
        cp = pltpu.make_async_copy(x_hbm, out_ref, sem)
        cp.start()
        cp.wait()

    # --- once per layer: shared feed-forward + first LayerNorm over ALL nodes,
    # chunked TM rows at a time (bounds vreg live ranges, no spill storms).
    # Stored once in f32 (residual into the 2nd LN) and once in bf16 (cast
    # exactly once per layer; RHS of the aggregation matmul).
    @pl.when((j == 0) & (k == 0))
    def _():
        w_lin = wlin_ref[...]
        b_lin = blin_ref[...]
        g_ff = gff_ref[0]
        b_ff = bff_ref[0]

        def body(r, carry):
            row = pl.multiple_of(r * tm, tm)
            x = out_ref[pl.ds(row, tm), :]                      # [tm, Hp] f32
            h = jnp.dot(x.astype(bf16), w_lin,
                        preferred_element_type=jnp.float32) + b_lin
            h = jnp.maximum(h, 0.0)
            f = _layer_norm(h + x, g_ff, b_ff, lane_mask, h_real)
            ff_ref[pl.ds(row, tm), :] = f
            ffb_ref[pl.ds(row, tm), :] = f.astype(bf16)
            return carry

        jax.lax.fori_loop(0, n_row_tiles, body, 0)

    # --- K-tiled message passing:
    #     acc[dst_tile] += A[dst_tile, src_tile] @ ff[src_tile]
    @pl.when(k == 0)
    def _():
        acc_ref[...] = jnp.zeros_like(acc_ref)

    src = pl.multiple_of(k * tk, tk)
    acc_ref[...] += jnp.dot(adj_ref[...].astype(bf16),          # int8 -> bf16
                            ffb_ref[pl.ds(src, tk), :],
                            preferred_element_type=jnp.float32)

    # --- last src tile: NodeApplyModule (linear + relu) + second LayerNorm,
    # written straight into the resident output (= next layer's features).
    @pl.when(k == pl.num_programs(2) - 1)
    def _():
        row = pl.multiple_of(j * tm, tm)
        ff_tile = ff_ref[pl.ds(row, tm), :]                     # [tm, Hp] f32
        att = jnp.dot(acc_ref[...].astype(bf16), wg_ref[0],
                      preferred_element_type=jnp.float32) + bg_ref[0]
        att = jnp.maximum(att, 0.0)
        out_ref[pl.ds(row, tm), :] = _layer_norm(
            att + ff_tile, gln_ref[0], bln_ref[0], lane_mask, h_real)


def gcn_net_forward(params, adj, features, nlayers):
    N, H = features.shape
    f32, bf16 = jnp.float32, jnp.bfloat16

    Hp = _round_up(max(H, 128), 128)          # lane-dense hidden dim
    TM = min(256, _round_up(N, 8))            # dst-node tile (multiple of 8)
    Np = _round_up(N, TM)
    if Np <= 2048:
        TK = Np                               # single src tile
    else:
        TK = 2048                             # src (contraction) tile; tune
        Np = _round_up(N, TK)                 # TK is a multiple of TM (=256)
    n_dst = Np // TM
    n_src = Np // TK

    def pad2(a, r, c):
        a = jnp.asarray(a, f32)
        return jnp.pad(a, ((0, r - a.shape[0]), (0, c - a.shape[1])))

    # Zero padding keeps padded lanes exactly zero through the whole stack
    # (gamma/beta padded with zeros => LayerNorm outputs 0 on padded lanes).
    x_p = pad2(features, Np, Hp)
    adj_p = pad2(adj, Np, Np).astype(jnp.int8)                  # 0/1 exact in int8
    wlin_p = pad2(params["w_lin_t"], Hp, Hp).astype(bf16)
    blin_p = pad2(params["b_lin"], 1, Hp)
    wg_p = jnp.stack([pad2(w, Hp, Hp) for w in params["w_gcn_t"]]).astype(bf16)
    bg_p = jnp.stack([pad2(b, 1, Hp) for b in params["b_gcn"]])
    gff_p = jnp.stack([pad2(g, 1, Hp) for g in params["ln_ff_gamma"]])
    bffn_p = jnp.stack([pad2(b, 1, Hp) for b in params["ln_ff_beta"]])
    gln_p = jnp.stack([pad2(g, 1, Hp) for g in params["ln_gamma"]])
    bln_p = jnp.stack([pad2(b, 1, Hp) for b in params["ln_beta"]])

    kernel = functools.partial(_fused_gcn_kernel, h_real=H, hp=Hp,
                               tm=TM, tk=TK, n_row_tiles=n_dst)

    # VMEM budget (resident out + f32 ff + bf16 ff + adj double-buffer +
    # weights + accumulator), with headroom; capped at 60 MiB to stay inside
    # v7x's 64 MiB per-TC VMEM.  On v5e/v6e raise toward ~100 MiB and grow TK.
    vmem_need = (Np * Hp * (4 + 4 + 2)
                 + 2 * TM * TK
                 + 2 * 2 * Hp * Hp * 2
                 + TM * Hp * 4
                 + 32 * Hp * 4)
    vmem_limit = int(min(max(vmem_need * 3 // 2, 32 * 1024 * 1024),
                         60 * 1024 * 1024))

    out = pl.pallas_call(
        kernel,
        out_shape=jax.ShapeDtypeStruct((Np, Hp), f32),
        grid_spec=pltpu.PrefetchScalarGridSpec(
            num_scalar_prefetch=0,
            grid=(nlayers, n_dst, n_src),
            in_specs=[
                pl.BlockSpec(memory_space=pl.ANY),                     # x (HBM, DMA'd once)
                pl.BlockSpec((TM, TK), lambda l, j, k: (j, k)),        # A int8 (dst, src) tile
                pl.BlockSpec((Hp, Hp), lambda l, j, k: (0, 0)),        # W_lin (resident)
                pl.BlockSpec((1, Hp), lambda l, j, k: (0, 0)),         # b_lin (resident)
                pl.BlockSpec((1, Hp, Hp), lambda l, j, k: (l, 0, 0)),  # W_gcn[l]
                pl.BlockSpec((1, 1, Hp), lambda l, j, k: (l, 0, 0)),   # b_gcn[l]
                pl.BlockSpec((1, 1, Hp), lambda l, j, k: (l, 0, 0)),   # ln_ff gamma[l]
                pl.BlockSpec((1, 1, Hp), lambda l, j, k: (l, 0, 0)),   # ln_ff beta[l]
                pl.BlockSpec((1, 1, Hp), lambda l, j, k: (l, 0, 0)),   # ln gamma[l]
                pl.BlockSpec((1, 1, Hp), lambda l, j, k: (l, 0, 0)),   # ln beta[l]
            ],
            # Constant block index => node features stay resident in VMEM for
            # the whole grid and are written back to HBM exactly once.
            out_specs=pl.BlockSpec((Np, Hp), lambda l, j, k: (0, 0)),
            scratch_shapes=[
                pltpu.VMEM((Np, Hp), f32),    # ff (f32, residual into 2nd LN)
                pltpu.VMEM((Np, Hp), bf16),   # ff (bf16, aggregation RHS)
                pltpu.VMEM((TM, Hp), f32),    # per-dst-tile aggregation accumulator
                pltpu.SemaphoreType.DMA,      # initial-feature copy semaphore
            ]),
        compiler_params=pltpu.CompilerParams(
            dimension_semantics=("arbitrary", "arbitrary", "arbitrary"),
            vmem_limit_bytes=vmem_limit),
    )(x_p, adj_p, wlin_p, blin_p, wg_p, bg_p, gff_p, bffn_p, gln_p, bln_p)

    return out[:N, :H]


# ----------------------------- references ----------------------------------
def _ln_ref(x, gamma, beta):
    mu = jnp.mean(x, axis=-1, keepdims=True)
    var = jnp.mean((x - mu) ** 2, axis=-1, keepdims=True)
    return (x - mu) * jax.lax.rsqrt(var + LN_EPS) * gamma + beta


def ref_forward(params, adj, features, nlayers, emulate_bf16):
    if emulate_bf16:
        def dot(a, b):
            return jnp.dot(a.astype(jnp.bfloat16), b.astype(jnp.bfloat16),
                           preferred_element_type=jnp.float32)
    else:
        def dot(a, b):
            return jnp.dot(a, b, preferred_element_type=jnp.float32)

    out = features
    for i in range(nlayers):
        ff = jax.nn.relu(dot(out, params["w_lin_t"]) + params["b_lin"])
        ff = _ln_ref(ff + out, params["ln_ff_gamma"][i], params["ln_ff_beta"][i])
        agg = dot(adj, ff)
        att = jax.nn.relu(dot(agg, params["w_gcn_t"][i]) + params["b_gcn"][i])
        out = _ln_ref(att + ff, params["ln_gamma"][i], params["ln_beta"][i])
    return out


def init_params(key, hdim, nlayers):
    ks = jax.random.split(key, 2 + 2 * nlayers)
    bound = 1.0 / jnp.sqrt(hdim)
    params = {
        # shared nn.Linear(hdim, hdim): stored pre-transposed [H_in, H_out]
        "w_lin_t": jax.random.uniform(ks[0], (hdim, hdim), jnp.float32, -bound, bound),
        "b_lin": jax.random.uniform(ks[1], (1, hdim), jnp.float32, -bound, bound),
        "w_gcn_t": [], "b_gcn": [],
        "ln_ff_gamma": [], "ln_ff_beta": [],
        "ln_gamma": [], "ln_beta": [],
    }
    for i in range(nlayers):
        kw, kb = ks[2 + 2 * i], ks[3 + 2 * i]
        params["w_gcn_t"].append(
            jax.random.uniform(kw, (hdim, hdim), jnp.float32, -bound, bound))
        params["b_gcn"].append(
            jax.random.uniform(kb, (1, hdim), jnp.float32, -bound, bound))
        params["ln_ff_gamma"].append(jnp.ones((1, hdim), jnp.float32))
        params["ln_ff_beta"].append(jnp.zeros((1, hdim), jnp.float32))
        params["ln_gamma"].append(jnp.ones((1, hdim), jnp.float32))
        params["ln_beta"].append(jnp.zeros((1, hdim), jnp.float32))
    return params


if __name__ == "__main__":
    N_NODES = 8      # nodes in the graph
    HDIM = 32        # hidden dim (padded to 128 lanes inside the wrapper)
    NLAYERS = 2

    key = jax.random.PRNGKey(0)
    k_feat, k_adj, k_param = jax.random.split(key, 3)

    features = jax.random.normal(k_feat, (N_NODES, HDIM), jnp.float32)
    # dense adjacency A[dst, src] = 1 for edge src -> dst (DGL copy_src + sum)
    adj = (jax.random.uniform(k_adj, (N_NODES, N_NODES)) < 0.4).astype(jnp.float32)

    params = init_params(k_param, HDIM, NLAYERS)

    out = gcn_net_forward(params, adj, features, NLAYERS)
    out = jax.block_until_ready(out)
    assert out.shape == (N_NODES, HDIM)

    # Tight check against a reference with the same bf16-MXU numerics, and a
    # looser check against the pure-f32 reference (bf16 matmul operands).
    ref_bf16 = ref_forward(params, adj, features, NLAYERS, emulate_bf16=True)
    ref_f32 = ref_forward(params, adj, features, NLAYERS, emulate_bf16=False)
    assert jnp.allclose(out, ref_bf16, atol=1e-2, rtol=1e-2)
    assert jnp.allclose(out, ref_f32, atol=5e-2, rtol=5e-2)

    print("KERNEL_OK")
</pallas_src>

<mosaic_0001>
module attributes {stable_mosaic.version = 11 : i64} {
  func.func @_fused_gcn_kernel(%arg0: i32, %arg1: i32, %arg2: i32, %arg3: memref<8x128xf32, #tpu.memory_space<any>>, %arg4: memref<8x8xi8, #tpu.memory_space<vmem>>, %arg5: memref<128x128xbf16, #tpu.memory_space<vmem>>, %arg6: memref<1x128xf32, #tpu.memory_space<vmem>>, %arg7: memref<1x128x128xbf16, #tpu.memory_space<vmem>>, %arg8: memref<1x1x128xf32, #tpu.memory_space<vmem>>, %arg9: memref<1x1x128xf32, #tpu.memory_space<vmem>>, %arg10: memref<1x1x128xf32, #tpu.memory_space<vmem>>, %arg11: memref<1x1x128xf32, #tpu.memory_space<vmem>>, %arg12: memref<1x1x128xf32, #tpu.memory_space<vmem>>, %arg13: memref<8x128xf32, #tpu.memory_space<vmem>>, %arg14: memref<8x128xf32, #tpu.memory_space<vmem>>, %arg15: memref<8x128xbf16, #tpu.memory_space<vmem>>, %arg16: memref<8x128xf32, #tpu.memory_space<vmem>>, %arg17: memref<!tpu.dma_semaphore, #tpu.memory_space<semaphore_mem>>) attributes {dimension_semantics = [#tpu.dimension_semantics<arbitrary>, #tpu.dimension_semantics<arbitrary>, #tpu.dimension_semantics<arbitrary>], iteration_bounds = array<i64: 2, 1, 1>, scalar_prefetch = 0 : i64, scratch_operands = 4 : i64, tpu.core_type = #tpu.core_type<tc>, window_params = [{}, {transform_indices = @transform_1, window_bounds = array<i64: 8, 8>}, {pipeline_mode = #tpu.pipeline_mode<synchronous>, transform_indices = @transform_2, window_bounds = array<i64: 128, 128>}, {pipeline_mode = #tpu.pipeline_mode<synchronous>, transform_indices = @transform_3, window_bounds = array<i64: 1, 128>}, {transform_indices = @transform_4, window_bounds = array<i64: 1, 128, 128>}, {transform_indices = @transform_5, window_bounds = array<i64: 1, 1, 128>}, {transform_indices = @transform_6, window_bounds = array<i64: 1, 1, 128>}, {transform_indices = @transform_7, window_bounds = array<i64: 1, 1, 128>}, {transform_indices = @transform_8, window_bounds = array<i64: 1, 1, 128>}, {transform_indices = @transform_9, window_bounds = array<i64: 1, 1, 128>}, {pipeline_mode = #tpu.pipeline_mode<synchronous>, transform_indices = @transform_10, window_bounds = array<i64: 8, 128>}]} {
    %0 = tpu.iota {dimensions = array<i32: 1>} : vector<1x128xi32>
    %c32_i32 = arith.constant 32 : i32
    %1 = vector.broadcast %c32_i32 : i32 to vector<1x128xi32>
    %2 = arith.cmpi slt, %0, %1 : vector<1x128xi32>
    %3 = arith.extui %2 : vector<1x128xi1> to vector<1x128xi32>
    %4 = arith.sitofp %3 : vector<1x128xi32> to vector<1x128xf32>
    %c0_i32 = arith.constant 0 : i32
    %5 = arith.cmpi eq, %arg0, %c0_i32 : i32
    %c0_i32_0 = arith.constant 0 : i32
    %6 = arith.cmpi eq, %arg1, %c0_i32_0 : i32
    %7 = arith.andi %5, %6 : i1
    %c0_i32_1 = arith.constant 0 : i32
    %8 = arith.cmpi eq, %arg2, %c0_i32_1 : i32
    %9 = arith.andi %7, %8 : i1
    %10 = arith.extui %9 : i1 to i32
    %c0_i32_2 = arith.constant 0 : i32
    %11 = arith.cmpi ne, %10, %c0_i32_2 : i32
    scf.if %11 {
      tpu.enqueue_dma source(%arg3 : memref<8x128xf32, #tpu.memory_space<any>>) target(%arg13 : memref<8x128xf32, #tpu.memory_space<vmem>>) target_semaphore(%arg17 : memref<!tpu.dma_semaphore, #tpu.memory_space<semaphore_mem>>)
      tpu.wait_dma2 semaphore(%arg17 : memref<!tpu.dma_semaphore, #tpu.memory_space<semaphore_mem>>) src(%arg3 : memref<8x128xf32, #tpu.memory_space<any>>) dst(%arg13 : memref<8x128xf32, #tpu.memory_space<vmem>>)
    } else {
    }
    %c0_i32_3 = arith.constant 0 : i32
    %12 = arith.cmpi eq, %arg1, %c0_i32_3 : i32
    %c0_i32_4 = arith.constant 0 : i32
    %13 = arith.cmpi eq, %arg2, %c0_i32_4 : i32
    %14 = arith.andi %12, %13 : i1
    %15 = arith.extui %14 : i1 to i32
    %c0_i32_5 = arith.constant 0 : i32
    %16 = arith.cmpi ne, %15, %c0_i32_5 : i32
    scf.if %16 {
      %c0_16 = arith.constant 0 : index
      %c0_17 = arith.constant 0 : index
      %33 = vector.load %arg5[%c0_16, %c0_17] : memref<128x128xbf16, #tpu.memory_space<vmem>>, vector<128x128xbf16>
      %c0_18 = arith.constant 0 : index
      %c0_19 = arith.constant 0 : index
      %34 = vector.load %arg6[%c0_18, %c0_19] : memref<1x128xf32, #tpu.memory_space<vmem>>, vector<1x128xf32>
      %c0_20 = arith.constant 0 : index
      %c0_21 = arith.constant 0 : index
      %c0_22 = arith.constant 0 : index
      %35 = vector.load %arg9[%c0_20, %c0_21, %c0_22] : memref<1x1x128xf32, #tpu.memory_space<vmem>>, vector<1x1x128xf32>
      %36 = vector.shape_cast %35 : vector<1x1x128xf32> to vector<1x128xf32>
      %c0_23 = arith.constant 0 : index
      %c0_24 = arith.constant 0 : index
      %c0_25 = arith.constant 0 : index
      %37 = vector.load %arg10[%c0_23, %c0_24, %c0_25] : memref<1x1x128xf32, #tpu.memory_space<vmem>>, vector<1x1x128xf32>
      %38 = vector.shape_cast %37 : vector<1x1x128xf32> to vector<1x128xf32>
      %c0_i32_26 = arith.constant 0 : i32
      %c8_i32_27 = arith.constant 8 : i32
      %39 = arith.muli %c0_i32_26, %c8_i32_27 : i32
      %40 = tpu.assume_multiple %39, 8 : i32
      %41 = arith.index_cast %40 : i32 to index
      %c0_28 = arith.constant 0 : index
      %42 = vector.load %arg13[%41, %c0_28] : memref<8x128xf32, #tpu.memory_space<vmem>>, vector<8x128xf32>
      %43 = arith.truncf %42 : vector<8x128xf32> to vector<8x128xbf16>
      %cst_29 = arith.constant dense<0.000000e+00> : vector<8x128xf32>
      %44 = tpu.matmul %43, %33, %cst_29 {dimension_numbers = #tpu.dot_dimension_numbers<[1], [0], [0], [1], [0, 0, 1, 1], [], []>} : vector<8x128xbf16>, vector<128x128xbf16>, vector<8x128xf32> -> vector<8x128xf32>
      %45 = vector.broadcast %34 : vector<1x128xf32> to vector<8x128xf32>
      %46 = arith.addf %44, %45 : vector<8x128xf32>
      %cst_30 = arith.constant 0.000000e+00 : f32
      %47 = vector.broadcast %cst_30 : f32 to vector<8x128xf32>
      %48 = arith.maximumf %46, %47 : vector<8x128xf32>
      %49 = arith.addf %48, %42 : vector<8x128xf32>
      %cst_31 = arith.constant dense<0.000000e+00> : vector<8xf32>
      %50 = vector.multi_reduction <add>, %49, %cst_31 [1] : vector<8x128xf32> to vector<8xf32>
      %51 = vector.shape_cast %50 : vector<8xf32> to vector<8x1xf32>
      %cst_32 = arith.constant 3.125000e-02 : f32
      %52 = vector.broadcast %cst_32 : f32 to vector<8x1xf32>
      %53 = arith.mulf %51, %52 : vector<8x1xf32>
      %54 = vector.broadcast %53 : vector<8x1xf32> to vector<8x128xf32>
      %55 = arith.subf %49, %54 : vector<8x128xf32>
      %56 = vector.broadcast %4 : vector<1x128xf32> to vector<8x128xf32>
      %57 = arith.mulf %55, %56 : vector<8x128xf32>
      %58 = arith.mulf %57, %57 : vector<8x128xf32>
      %cst_33 = arith.constant dense<0.000000e+00> : vector<8xf32>
      %59 = vector.multi_reduction <add>, %58, %cst_33 [1] : vector<8x128xf32> to vector<8xf32>
      %60 = vector.shape_cast %59 : vector<8xf32> to vector<8x1xf32>
      %cst_34 = arith.constant 3.125000e-02 : f32
      %61 = vector.broadcast %cst_34 : f32 to vector<8x1xf32>
      %62 = arith.mulf %60, %61 : vector<8x1xf32>
      %cst_35 = arith.constant 9.99999974E-6 : f32
      %63 = vector.broadcast %cst_35 : f32 to vector<8x1xf32>
      %64 = arith.addf %62, %63 : vector<8x1xf32>
      %65 = math.rsqrt %64 : vector<8x1xf32>
      %66 = vector.broadcast %65 : vector<8x1xf32> to vector<8x128xf32>
      %67 = arith.mulf %57, %66 : vector<8x128xf32>
      %68 = vector.broadcast %36 : vector<1x128xf32> to vector<8x128xf32>
      %69 = arith.mulf %67, %68 : vector<8x128xf32>
      %70 = vector.broadcast %38 : vector<1x128xf32> to vector<8x128xf32>
      %71 = arith.addf %69, %70 : vector<8x128xf32>
      %72 = arith.index_cast %40 : i32 to index
      %c0_36 = arith.constant 0 : index
      %73 = vector.load %arg14[%72, %c0_36] : memref<8x128xf32, #tpu.memory_space<vmem>>, vector<8x128xf32>
      tpu.vector_store %arg14[%72, %c0_36], %71 {strides = array<i32>} : memref<8x128xf32, #tpu.memory_space<vmem>>, vector<8x128xf32>,
      %74 = arith.truncf %71 : vector<8x128xf32> to vector<8x128xbf16>
      %75 = arith.index_cast %40 : i32 to index
      %c0_37 = arith.constant 0 : index
      %76 = vector.load %arg15[%75, %c0_37] : memref<8x128xbf16, #tpu.memory_space<vmem>>, vector<8x128xbf16>
      tpu.vector_store %arg15[%75, %c0_37], %74 {strides = array<i32>} : memref<8x128xbf16, #tpu.memory_space<vmem>>, vector<8x128xbf16>,
      %c1_i32 = arith.constant 1 : i32
    } else {
    }
    %c0_i32_6 = arith.constant 0 : i32
    %17 = arith.cmpi eq, %arg2, %c0_i32_6 : i32
    %18 = arith.extui %17 : i1 to i32
    %c0_i32_7 = arith.constant 0 : i32
    %19 = arith.cmpi ne, %18, %c0_i32_7 : i32
    scf.if %19 {
      %cst_16 = arith.constant 0.000000e+00 : f32
      %33 = vector.broadcast %cst_16 : f32 to vector<8x128xf32>
      %c0_17 = arith.constant 0 : index
      %c0_18 = arith.constant 0 : index
      %34 = vector.load %arg16[%c0_17, %c0_18] : memref<8x128xf32, #tpu.memory_space<vmem>>, vector<8x128xf32>
      tpu.vector_store %arg16[%c0_17, %c0_18], %33 {strides = array<i32>} : memref<8x128xf32, #tpu.memory_space<vmem>>, vector<8x128xf32>,
    } else {
    }
    %c8_i32 = arith.constant 8 : i32
    %20 = arith.muli %arg2, %c8_i32 : i32
    %21 = tpu.assume_multiple %20, 8 : i32
    %c0 = arith.constant 0 : index
    %c0_8 = arith.constant 0 : index
    %22 = vector.load %arg16[%c0, %c0_8] : memref<8x128xf32, #tpu.memory_space<vmem>>, vector<8x128xf32>
    %c0_9 = arith.constant 0 : index
    %c0_10 = arith.constant 0 : index
    %23 = vector.load %arg4[%c0_9, %c0_10] : memref<8x8xi8, #tpu.memory_space<vmem>>, vector<8x8xi8>
    %24 = arith.sitofp %23 : vector<8x8xi8> to vector<8x8xbf16>
    %25 = arith.index_cast %21 : i32 to index
    %c0_11 = arith.constant 0 : index
    %26 = vector.load %arg15[%25, %c0_11] : memref<8x128xbf16, #tpu.memory_space<vmem>>, vector<8x128xbf16>
    %cst = arith.constant dense<0.000000e+00> : vector<8x128xf32>
    %27 = tpu.matmul %24, %26, %cst {dimension_numbers = #tpu.dot_dimension_numbers<[1], [0], [0], [1], [0, 0, 1, 1], [], []>} : vector<8x8xbf16>, vector<8x128xbf16>, vector<8x128xf32> -> vector<8x128xf32>
    %28 = arith.addf %22, %27 : vector<8x128xf32>
    %c0_12 = arith.constant 0 : index
    %c0_13 = arith.constant 0 : index
    %29 = vector.load %arg16[%c0_12, %c0_13] : memref<8x128xf32, #tpu.memory_space<vmem>>, vector<8x128xf32>
    tpu.vector_store %arg16[%c0_12, %c0_13], %28 {strides = array<i32>} : memref<8x128xf32, #tpu.memory_space<vmem>>, vector<8x128xf32>,
    %c0_i32_14 = arith.constant 0 : i32
    %30 = arith.cmpi eq, %arg2, %c0_i32_14 : i32
    %31 = arith.extui %30 : i1 to i32
    %c0_i32_15 = arith.constant 0 : i32
    %32 = arith.cmpi ne, %31, %c0_i32_15 : i32
    scf.if %32 {
      %c8_i32_16 = arith.constant 8 : i32
      %33 = arith.muli %arg1, %c8_i32_16 : i32
      %34 = tpu.assume_multiple %33, 8 : i32
      %35 = arith.index_cast %34 : i32 to index
      %c0_17 = arith.constant 0 : index
      %36 = vector.load %arg14[%35, %c0_17] : memref<8x128xf32, #tpu.memory_space<vmem>>, vector<8x128xf32>
      %c0_18 = arith.constant 0 : index
      %c0_19 = arith.constant 0 : index
      %37 = vector.load %arg16[%c0_18, %c0_19] : memref<8x128xf32, #tpu.memory_space<vmem>>, vector<8x128xf32>
      %38 = arith.truncf %37 : vector<8x128xf32> to vector<8x128xbf16>
      %c0_20 = arith.constant 0 : index
      %c0_21 = arith.constant 0 : index
      %c0_22 = arith.constant 0 : index
      %39 = vector.load %arg7[%c0_20, %c0_21, %c0_22] : memref<1x128x128xbf16, #tpu.memory_space<vmem>>, vector<1x128x128xbf16>
      %40 = vector.shape_cast %39 : vector<1x128x128xbf16> to vector<128x128xbf16>
      %cst_23 = arith.constant dense<0.000000e+00> : vector<8x128xf32>
      %41 = tpu.matmul %38, %40, %cst_23 {dimension_numbers = #tpu.dot_dimension_numbers<[1], [0], [0], [1], [0, 0, 1, 1], [], []>} : vector<8x128xbf16>, vector<128x128xbf16>, vector<8x128xf32> -> vector<8x128xf32>
      %c0_24 = arith.constant 0 : index
      %c0_25 = arith.constant 0 : index
      %c0_26 = arith.constant 0 : index
      %42 = vector.load %arg8[%c0_24, %c0_25, %c0_26] : memref<1x1x128xf32, #tpu.memory_space<vmem>>, vector<1x1x128xf32>
      %43 = vector.shape_cast %42 : vector<1x1x128xf32> to vector<1x128xf32>
      %44 = vector.broadcast %43 : vector<1x128xf32> to vector<8x128xf32>
      %45 = arith.addf %41, %44 : vector<8x128xf32>
      %cst_27 = arith.constant 0.000000e+00 : f32
      %46 = vector.broadcast %cst_27 : f32 to vector<8x128xf32>
      %47 = arith.maximumf %45, %46 : vector<8x128xf32>
      %48 = arith.addf %47, %36 : vector<8x128xf32>
      %c0_28 = arith.constant 0 : index
      %c0_29 = arith.constant 0 : index
      %c0_30 = arith.constant 0 : index
      %49 = vector.load %arg11[%c0_28, %c0_29, %c0_30] : memref<1x1x128xf32, #tpu.memory_space<vmem>>, vector<1x1x128xf32>
      %50 = vector.shape_cast %49 : vector<1x1x128xf32> to vector<1x128xf32>
      %c0_31 = arith.constant 0 : index
      %c0_32 = arith.constant 0 : index
      %c0_33 = arith.constant 0 : index
      %51 = vector.load %arg12[%c0_31, %c0_32, %c0_33] : memref<1x1x128xf32, #tpu.memory_space<vmem>>, vector<1x1x128xf32>
      %52 = vector.shape_cast %51 : vector<1x1x128xf32> to vector<1x128xf32>
      %cst_34 = arith.constant dense<0.000000e+00> : vector<8xf32>
      %53 = vector.multi_reduction <add>, %48, %cst_34 [1] : vector<8x128xf32> to vector<8xf32>
      %54 = vector.shape_cast %53 : vector<8xf32> to vector<8x1xf32>
      %cst_35 = arith.constant 3.125000e-02 : f32
      %55 = vector.broadcast %cst_35 : f32 to vector<8x1xf32>
      %56 = arith.mulf %54, %55 : vector<8x1xf32>
      %57 = vector.broadcast %56 : vector<8x1xf32> to vector<8x128xf32>
      %58 = arith.subf %48, %57 : vector<8x128xf32>
      %59 = vector.broadcast %4 : vector<1x128xf32> to vector<8x128xf32>
      %60 = arith.mulf %58, %59 : vector<8x128xf32>
      %61 = arith.mulf %60, %60 : vector<8x128xf32>
      %cst_36 = arith.constant dense<0.000000e+00> : vector<8xf32>
      %62 = vector.multi_reduction <add>, %61, %cst_36 [1] : vector<8x128xf32> to vector<8xf32>
      %63 = vector.shape_cast %62 : vector<8xf32> to vector<8x1xf32>
      %cst_37 = arith.constant 3.125000e-02 : f32
      %64 = vector.broadcast %cst_37 : f32 to vector<8x1xf32>
      %65 = arith.mulf %63, %64 : vector<8x1xf32>
      %cst_38 = arith.constant 9.99999974E-6 : f32
      %66 = vector.broadcast %cst_38 : f32 to vector<8x1xf32>
      %67 = arith.addf %65, %66 : vector<8x1xf32>
      %68 = math.rsqrt %67 : vector<8x1xf32>
      %69 = vector.broadcast %68 : vector<8x1xf32> to vector<8x128xf32>
      %70 = arith.mulf %60, %69 : vector<8x128xf32>
      %71 = vector.broadcast %50 : vector<1x128xf32> to vector<8x128xf32>
      %72 = arith.mulf %70, %71 : vector<8x128xf32>
      %73 = vector.broadcast %52 : vector<1x128xf32> to vector<8x128xf32>
      %74 = arith.addf %72, %73 : vector<8x128xf32>
      %75 = arith.index_cast %34 : i32 to index
      %c0_39 = arith.constant 0 : index
      %76 = vector.load %arg13[%75, %c0_39] : memref<8x128xf32, #tpu.memory_space<vmem>>, vector<8x128xf32>
      tpu.vector_store %arg13[%75, %c0_39], %74 {strides = array<i32>} : memref<8x128xf32, #tpu.memory_space<vmem>>, vector<8x128xf32>,
    } else {
    }
    return
  }
  func.func @transform_1(%arg0: i32, %arg1: i32, %arg2: i32) -> (i32, i32) {
    %c0_i32 = arith.constant 0 : i32
    return %arg1, %arg2 : i32, i32
  }
  func.func @transform_2(%arg0: i32, %arg1: i32, %arg2: i32) -> (i32, i32) {
    %c0_i32 = arith.constant 0 : i32
    %c0_i32_0 = arith.constant 0 : i32
    %c0_i32_1 = arith.constant 0 : i32
    return %c0_i32, %c0_i32_0 : i32, i32
  }
  func.func @transform_3(%arg0: i32, %arg1: i32, %arg2: i32) -> (i32, i32) {
    %c0_i32 = arith.constant 0 : i32
    %c0_i32_0 = arith.constant 0 : i32
    %c0_i32_1 = arith.constant 0 : i32
    return %c0_i32, %c0_i32_0 : i32, i32
  }
  func.func @transform_4(%arg0: i32, %arg1: i32, %arg2: i32) -> (i32, i32, i32) {
    %c0_i32 = arith.constant 0 : i32
    %c0_i32_0 = arith.constant 0 : i32
    %c0_i32_1 = arith.constant 0 : i32
    return %arg0, %c0_i32, %c0_i32_0 : i32, i32, i32
  }
  func.func @transform_5(%arg0: i32, %arg1: i32, %arg2: i32) -> (i32, i32, i32) {
    %c0_i32 = arith.constant 0 : i32
    %c0_i32_0 = arith.constant 0 : i32
    %c0_i32_1 = arith.constant 0 : i32
    return %arg0, %c0_i32, %c0_i32_0 : i32, i32, i32
  }
  func.func @transform_6(%arg0: i32, %arg1: i32, %arg2: i32) -> (i32, i32, i32) {
    %c0_i32 = arith.constant 0 : i32
    %c0_i32_0 = arith.constant 0 : i32
    %c0_i32_1 = arith.constant 0 : i32
    return %arg0, %c0_i32, %c0_i32_0 : i32, i32, i32
  }
  func.func @transform_7(%arg0: i32, %arg1: i32, %arg2: i32) -> (i32, i32, i32) {
    %c0_i32 = arith.constant 0 : i32
    %c0_i32_0 = arith.constant 0 : i32
    %c0_i32_1 = arith.constant 0 : i32
    return %arg0, %c0_i32, %c0_i32_0 : i32, i32, i32
  }
  func.func @transform_8(%arg0: i32, %arg1: i32, %arg2: i32) -> (i32, i32, i32) {
    %c0_i32 = arith.constant 0 : i32
    %c0_i32_0 = arith.constant 0 : i32
    %c0_i32_1 = arith.constant 0 : i32
    return %arg0, %c0_i32, %c0_i32_0 : i32, i32, i32
  }
  func.func @transform_9(%arg0: i32, %arg1: i32, %arg2: i32) -> (i32, i32, i32) {
    %c0_i32 = arith.constant 0 : i32
    %c0_i32_0 = arith.constant 0 : i32
    %c0_i32_1 = arith.constant 0 : i32
    return %arg0, %c0_i32, %c0_i32_0 : i32, i32, i32
  }
  func.func @transform_10(%arg0: i32, %arg1: i32, %arg2: i32) -> (i32, i32) {
    %c0_i32 = arith.constant 0 : i32
    %c0_i32_0 = arith.constant 0 : i32
    %c0_i32_1 = arith.constant 0 : i32
    return %c0_i32, %c0_i32_0 : i32, i32
  }
}

</mosaic_0001>

<bundles_post_ra>
// kernel: tpu_custom_call.1
= control target key start
LH: loop header
LB: loop body
LE: loop exit
PB: predicated region body
PF: predicated region fallthrough
CT: control target
= control target key end

     0   :  { %s1799_s0 = inlined_call_operand.hbm [shape: f32[8,128], index: 0, kind: input, shape index: {}]   ;;  %s1800_s1 = inlined_call_operand.vmem [shape: s8[8,8], index: 1, kind: input, shape index: {}]   ;;  %s1801_s2 = inlined_call_operand.hbm [shape: bf16[128,128], index: 2, kind: input, shape index: {}]   ;;  %s1802_s3 = inlined_call_operand.vmem [shape: f32[1,128], index: 3, kind: input, shape index: {}]   ;;  %s1803_s4 = inlined_call_operand.hbm [shape: bf16[2,128,128], index: 4, kind: input, shape index: {}]   ;;  %s1804_s5 = inlined_call_operand.vmem [shape: f32[2,1,128], index: 5, kind: input, shape index: {}]   ;;  %s1805_s6 = inlined_call_operand.vmem [shape: f32[2,1,128], index: 6, kind: input, shape index: {}]   ;;  %s1806_s7 = inlined_call_operand.vmem [shape: f32[2,1,128], index: 7, kind: input, shape index: {}]   ;;  %s1807_s8 = inlined_call_operand.vmem [shape: f32[2,1,128], index: 8, kind: input, shape index: {}]   ;;  %s1808_s9 = inlined_call_operand.vmem [shape: f32[2,1,128], index: 9, kind: input, shape index: {}]   ;;  %s1809_s10 = inlined_call_operand.hbm [shape: f32[8,128], index: 10, kind: output, shape index: {}]  }
   0x1   :  { %1817 = sst [smem:[#allocation20_spill]] %s1800_s1 }
   0x2   :  { %1818 = sst [smem:[#allocation21_spill]] %s1801_s2 }
   0x3   :  { %1819 = sst [smem:[#allocation22_spill]] %s1809_s10 }
   0x4   :  { %15 = vsyncpa [#allocation7], 0 }
   0x5   :  { %16 = vsyncpa [#allocation10], 0 }
   0x6   :  { %18 = vsyncpa [#allocation10 + $0x1], 0 }
   0x7   :  { %19 = vsyncpa [#allocation8], 0  ;;  %s1467_s13 = smov 0   ;;  %s1469_s14 = smov 0  }
   0x8   :  { %s1471_s15 = smov 0   ;;  %s1473_s16 = smov 0  }
   0x9   :  { %s1475_s17 = smov 0   ;;  %s1477_s18 = smov 0  }
   0xa LB: > { %s1814_s19 = sadd.s32 4294967295, %s1403_s18   ;;  %p134_p0 = scmp.ne.s32.totalorder %s1387_s14, %s1383_s13  ;;  %s1403_s18 = sphi %s1477_s18, %s25_s18   ;;  %s1399_s17 = sphi %s1475_s17, %s1840_s17   ;;  %s1395_s16 = sphi %s1473_s16, %s1839_s16   ;;  %s1391_s15 = sphi %s1471_s15, %s1838_s15   ;;  %s1387_s14 = sphi %s1469_s14, %s1837_s14   ;;  %s1383_s13 = sphi %s1467_s13, %s1836_s13  }
   0xb   : > { %p1499_p1 = scmp.eq.s32.totalorder %s1814_s19, 0  ;;  %p1022_p2 = scmp.ge.s32.totalorder %s1403_s18, 1 }
   0xc   : > { %p296_p3 = scmp.lt.s32.totalorder %s1403_s18, 3  ;;  %s1405_s23 = smov [#allocation6]  }
   0xd   : > { %s1820_s20 = scalar_select %p1499_p1, 1, 0 }
   0xe   : > { %p1507_p4 = por %p1499_p1, %p134_p0  ;;  %p1511_p5 = pnand %p1022_p2, %p296_p3 }
   0xf   : > { %s318_s24 = sshll.u32 %s1405_s23, 4  ;;  %s44_s26 = sadd.s32 1, %s1399_s17  ;;  %s319_s24 = int_to_ptr.vmem [resolvable:$true] %s318_s24 }
  0x10   : > { %s1821_s21 = scalar_select %p1507_p4, 1, 0 }
  0x11   : > { %s1822_s22 = scalar_select %p1511_p5, 1, 0 }
  0x12   : > { %p1144_p6 = pneg %p1511_p5  ;;  %s1824_s2 = sld [smem:[#allocation21_spill]] }
  0x14   : > { %p1519_p7 = pnand %p1144_p6, %p1499_p1 }
  0x16   : > { %p1233_p9 = pneg %p1519_p7 }
  0x18   : > { %s1231_s29 = scalar_lea.hbm %s1824_s2, 1024 }
  0x19   : > { %p1232_p8 = scmp.ne.s32.totalorder %s1824_s2, %s1231_s29  ;;  %p1238_p12 = scmp.lt.u32.totalorder %s1231_s29, %s1824_s2 }
  0x1b   : > { %p1234_p10 = pnand %p1233_p9, %p1232_p8 }
  0x1d   : > { %p1235_p11 = pneg %p1234_p10 }
  0x1f   : > { %p1240_p13 = pnand %p1238_p12, %p1235_p11 }
  0x21   : > { %1243 = shalt.err (!%p1240_p13)
}
  0x22   : > { %s1244_s23 = scalar_lea.vmem %s319_s24, 1024  ;;  %p1252_p6 = scmp.lt.s32.totalorder %s319_s24, %s319_s24 }
  0x23   : > { %p1245_p0 = scmp.ne.s32.totalorder %s319_s24, %s1244_s23  ;;  %p1253_p4 = scmp.lt.s32.totalorder %s1244_s23, %s1244_s23 }
  0x25   : > { %p1247_p2 = pnand %p1245_p0, %p1233_p9  ;;  %p1254_p1 = por %p1253_p4, %p1252_p6 }
  0x27   : > { %p1248_p3 = pneg %p1247_p2 }
  0x29   : > { %p1255_p5 = pnand %p1254_p1, %p1248_p3 }
  0x2b   : > { %1258 = shalt.err (!%p1255_p5)
}
  0x2c   : > { %s1816_s27 = smov 64   ;;  %s1407_s28 = smov 4  }
  0x2d   : > { %1147 = dma.hbm_to_vmem [thread:$0]  (!%p1519_p7), %s1824_s2, 1024, %s319_s24, [#allocation7], %s1816_s27, %s1816_s27, %s1407_s28  }
  0x2e   : > { %p46_p1 = scmp.ge.s32.totalorder %s44_s26, 2  ;;  %s121_s11 = sadd.s32 1, %s1391_s15 }
  0x2f   : > { %p128_p4 = scmp.ne.s32.totalorder %s1391_s15, %s1387_s14  ;;  %p129_p5 = scmp.eq.s32.totalorder %s1403_s18, 0 }
  0x30   : > { %s1842_s26 = smov (%p46_p1, %s44_s26), 0  ;;  %p1153_p9 = scmp.lt.s32.totalorder %s1403_s18, 2 }
  0x31   : > { %p130_p8 = por %p129_p5, %p128_p4  ;;  %s118_s12 = ssub.s32 %s1399_s17, %s1842_s26 }
  0x32   : > { %s335_s13 = sand.u32 1, %s1391_s15   ;;  %p119_p10 = scmp.eq.s32.totalorder %s118_s12, 0 }
  0x33   : > { %s1026_s25 = sshll.u32 %s335_s13, 6  ;;  %s1063_s23 = sshll.u32 %s1399_s17, 10 }
  0x34   : > { %s1555_s19 = scalar_select %p119_p10, %s1391_s15, %s121_s11  }
  0x35   : > { %s1560_s24 = scalar_lea.hbm %s1803_s4, %s1063_s23  ;;  %s339_s29 = scalar_lea.vmem [#allocation9], %s1026_s25 }
  0x36   : > { %s346_s30 = sshll.u32 %s339_s29, 4  ;;  %p1562_p7 = pnand %p1153_p9, %p130_p8  ;;  %s1566_s30 = int_to_ptr.vmem [resolvable:$true] %s346_s30 }
  0x37   : > { %s1568_s11 = scalar_lea.sflag [#allocation10], %s335_s13  ;;  %s1259_s12 = scalar_lea.hbm %s1560_s24, 1024 }
  0x38   : > { %p1260_p11 = scmp.ne.s32.totalorder %s1560_s24, %s1259_s12  ;;  %p1261_p12 = pneg %p1562_p7 }
  0x39   : > { %s1264_s25 = scalar_lea.hbm %s1803_s4, 2048  ;;  %p1265_p2 = scmp.lt.u32.totalorder %s1560_s24, %s1803_s4 }
  0x3a   : > { %p1262_p13 = pnand %p1261_p12, %p1260_p11  ;;  %p1266_p3 = scmp.lt.u32.totalorder %s1264_s25, %s1259_s12 }
  0x3b   : > { %p1268_p1 = scmp.lt.u32.totalorder %s1259_s12, %s1560_s24 }
  0x3c   : > { %p1263_p0 = pneg %p1262_p13  ;;  %p1267_p6 = por %p1266_p3, %p1265_p2 }
  0x3e   : > { %p1269_p4 = por %p1268_p1, %p1267_p6 }
  0x40   : > { %p1270_p5 = pnand %p1269_p4, %p1263_p0 }
  0x42   : > { %1273 = shalt.err (!%p1270_p5)
}
  0x43   : > { %s1274_s13 = scalar_lea.vmem %s1566_s30, 1024  ;;  %s1408_s1 = smov [#allocation9]  }
  0x44   : > { %p1275_p8 = scmp.ne.s32.totalorder %s1566_s30, %s1274_s13  ;;  %s1279_s10 = sshll.u32 %s1408_s1, 4  ;;  %s1280_s10 = int_to_ptr.vmem [resolvable:$false] %s1279_s10 }
  0x45   : > { %s1281_s23 = scalar_lea.vmem %s1280_s10, 2048  ;;  %p1282_p11 = scmp.lt.s32.totalorder %s1566_s30, %s1280_s10 }
  0x46   : > { %p1277_p9 = pnand %p1275_p8, %p1261_p12  ;;  %p1283_p13 = scmp.lt.s32.totalorder %s1281_s23, %s1274_s13 }
  0x48   : > { %p1278_p10 = pneg %p1277_p9  ;;  %p1284_p2 = por %p1283_p13, %p1282_p11 }
  0x4a   : > { %p1285_p3 = pnand %p1284_p2, %p1278_p10 }
  0x4c   : > { %1288 = shalt.err (!%p1285_p3)
}
  0x4d   : > { %s1826_s12 = smov 64   ;;  %p1827_p12 = scmp.ne.s32.totalorder %s1822_s22, 0 }
  0x4e   : > { %1151 = dma.hbm_to_vmem [thread:$0]  (!%p1562_p7), %s1560_s24, 1024, %s1566_s30, %s1568_s11, %s1826_s12, %s1826_s12, %s1407_s28  }
  0x4f   : > { %388 = sbr.rel (%p1827_p12) target bundleno = 1460 (0x5b4), region = 56  ;;  %p1828_p0 = scmp.ne.s32.totalorder (!%p1827_p12), %s1820_s20, 0 }
  0x56   : > { %1366 = dma.done.wait (%p1828_p0), [#allocation7], 1024  }
  0x57   : > { %1368 = vsyncadd (%p1828_p0), [#allocation7], 4294966272  ;;  %s394_s25 = sand.u32 1, %s1387_s14   ;;  %p1829_p6 = scmp.ne.s32.totalorder %s1821_s21, 0 }
  0x58   : > { %s1031_s27 = sshll.u32 %s394_s25, 6  ;;  %s395_s29 = scalar_lea.sflag [#allocation10], %s394_s25 }
  0x59   : > { %s1606_s13 = scalar_lea.vmem [#allocation9], %s1031_s27 }
  0x5a   : > { %1370 = dma.done.wait (%p1829_p6), %s395_s29, 1024  }
  0x5b   : > { %1372 = vsyncadd (%p1829_p6), %s395_s29, 4294966272  ;;  %p457_p7 = scmp.lt.s32.totalorder %s1395_s16, 1  ;;  %v473_v0 = vlaneseq  ;;  %p478_p1 = scmp.eq.s32.totalorder %s1395_s16, 0  ;;  %v1410_v2 = vmov 0.0  }
  0x5c   : > { %s1409_s20 = smov [#allocation11]   ;;  %s1289_s30 = scalar_lea.hbm %s1799_s0, 128 }
  0x5d   : > { %s1614_s22 = scalar_select %p457_p7, %s1395_s16, 1  ;;  %v474_v1 = vand.u32 127, %v473_v0 }
  0x5e   : > { %s494_s28 = sshll.u32 %s1409_s20, 4  ;;  %p1290_p4 = scmp.ne.s32.totalorder %s1799_s0, %s1289_s30  ;;  %s1640_s28 = int_to_ptr.vmem [resolvable:$true] %s494_s28 }
  0x5f   : > { %s462_s10 = scalar_lea.vmem %s1805_s6, %s1614_s22  ;;  %vm475_vm0 = vcmp.lt.s32.totalorder %v474_v1, 32  ;;  %s465_s25 = scalar_lea.vmem %s1806_s7, %s1614_s22 }
  0x60   : > { %s468_s2 = scalar_lea.vmem %s1807_s8, %s1614_s22  ;;  %v1634_v3 = vsel %vm475_vm0, 1.0, %v1410_v2  ;;  %s471_s21 = scalar_lea.vmem %s1808_s9, %s1614_s22 }
  0x61   : > { %p1291_p5 = pnand %p1290_p4, %p478_p1  ;;  %p1295_p9 = scmp.lt.u32.totalorder %s1289_s30, %s1799_s0 }
  0x63   : > { %p1292_p8 = pneg %p1291_p5 }
  0x65   : > { %p1297_p10 = pnand %p1295_p9, %p1292_p8 }
  0x67   : > { %1300 = shalt.err (!%p1297_p10)  }
  0x68   : > { %s1654_s20 = scalar_lea.vmem %s1640_s28, 128  ;;  %p1308_p3 = scmp.lt.s32.totalorder %s1640_s28, %s1640_s28 }
  0x69   : > { %p1302_p11 = scmp.ne.s32.totalorder %s1640_s28, %s1654_s20  ;;  %p1309_p12 = scmp.lt.s32.totalorder %s1654_s20, %s1654_s20 }
  0x6b   : > { %p1303_p13 = pnand %p1302_p11, %p478_p1  ;;  %p1667_p0 = por %p1309_p12, %p1308_p3 }
  0x6d   : > { %p1304_p2 = pneg %p1303_p13 }
  0x6f   : > { %p1311_p6 = pnand %p1667_p0, %p1304_p2 }
  0x71   : > { %1314 = shalt.err (!%p1311_p6)  }
  0x72   : > { %1138 = dma.hbm_to_vmem [thread:$0]  (%p478_p1), %s1799_s0, 128, %s1640_s28, [#allocation5] }
  0x73   : > { %1374 = dma.done.wait (%p478_p1), [#allocation5], 128 }
  0x74   : > { %1376 = vsyncadd (%p478_p1), [#allocation5], 4294967168  ;;  %1086 = vmatprep.subr.bf16.mxu0 %v1410_v2  ;;  %1106 = vmatprep.subr.bf16.mxu1 %v1410_v2  ;;  %vm1411_vm1 = vmmov 0   ;;  %v1211_v4 = vld [vmem:[#allocation6] sm:$0xff]   ;;  %v1212_v5 = vld [vmem:[#allocation6 + $0x8] sm:$0xff]   ;;  %vm668_vm2 = vcmask 1043456   ;;  %s1832_s1 = scalar_lea.vmem %s1804_s5, %s1614_s22 }
  0x75   : > { %1102 = vmatprep.mubr.msk.bf16.mxu0 %vm1411_vm1, %v1410_v2  ;;  %1108 = vmatprep.mubr.msk.bf16.mxu1 %vm1411_vm1, %v1410_v2  ;;  %v1213_v6 = vld [vmem:[#allocation6 + $0x10] sm:$0xff]   ;;  %v1214_v7 = vld [vmem:[#allocation6 + $0x18] sm:$0xff]   ;;  %v1215_v8 = vld [vmem:[#allocation6 + $0x20] sm:$0xff]   ;;  %s1831_s16 = sld [smem:[#allocation20_spill]]  ;;  %vm664_vm3 = vcmask 64512   ;;  %s1833_s29 = sadd.s32 4294967295, %s1403_s18  }
  0x76   : > { %1087 = vmatpush3.bf16.msra.mxu0 %v1211_v4  ;;  %v1216_v9 = vld [vmem:[#allocation6 + $0x28] sm:$0xff]   ;;  %v1217_v10 = vld [vmem:[#allocation6 + $0x30] sm:$0xff]   ;;  %v1218_v11 = vld [vmem:[#allocation6 + $0x38] sm:$0xff]   ;;  %p1749_p7 = scmp.eq.s32.totalorder %s1833_s29, 1 }
  0x77   : > { %1088 = vmatprep.subr.bf16.mxu0 %v1410_v2  ;;  %v524_v12 = vld [vmem:[#allocation11] sm:$0xff]  ;;  %v1035_v14 = vld [vmem:[%s1802_s3] ss:$0 sm:$0xff]  ;;  %v1220_v42 = vld [vmem:[%s1606_s13 + $0x8] sm:$0xff]  }
  0x78   : > { %v525_v13 = vpack.c.bf16 %v524_v12, %v524_v12  ;;  %v1044_v31 = vld [vmem:[%s462_s10] ss:$0 sm:$0xff]  ;;  %v1219_v41 = vld [vmem:[%s1606_s13] sm:$0xff]   ;;  %v1221_v43 = vld [vmem:[%s1606_s13 + $0x10] sm:$0xff]   ;;  %p1317_p1 = pnand %p1302_p11, %p1749_p7 }
  0x79   : > { %v1045_v33 = vld [vmem:[%s465_s25] ss:$0 sm:$0xff]  ;;  %v1223_v45 = vld [vmem:[%s1606_s13 + $0x20] sm:$0xff]   ;;  %v1224_v46 = vld [vmem:[%s1606_s13 + $0x28] sm:$0xff]  }
  0x7a   : > { %1089 = vmatpush3.bf16.msra.mxu0 %v1212_v5  ;;  %v1222_v44 = vld [vmem:[%s1606_s13 + $0x18] sm:$0xff]   ;;  %v1225_v47 = vld [vmem:[%s1606_s13 + $0x30] sm:$0xff]   ;;  %p1318_p4 = pneg %p1317_p1 }
  0x7b   : > { %1090 = vmatprep.subr.bf16.mxu0 %v1410_v2  ;;  %v657_v37 = vld [vmem:[%s1831_s16] sm:$0x3] }
  0x7c   : > { %v658_v40 = vunpack.c.l.s8.bf16 %v657_v37  ;;  %v1226_v48 = vld [vmem:[%s1606_s13 + $0x38] sm:$0xff]   ;;  %p1325_p5 = pnand %p1318_p4, %p1667_p0 }
  0x7d   : > { %v1047_v54 = vld [vmem:[%s1832_s1] ss:$0 sm:$0xff] }
  0x7e   : > { %1091 = vmatpush3.bf16.msra.mxu0 %v1213_v6 }
  0x7f   : > { %1092 = vmatprep.subr.bf16.mxu0 %v1410_v2 }
  0x82   : > { %1093 = vmatpush3.bf16.msra.mxu0 %v1214_v7 }
  0x83   : > { %1094 = vmatprep.subr.bf16.mxu0 %v1410_v2 }
  0x86   : > { %1095 = vmatpush3.bf16.msra.mxu0 %v1215_v8  ;;  %v1056_v8 = vld [vmem:[%s468_s2] ss:$0 sm:$0xff] }
  0x87   : > { %1096 = vmatprep.subr.bf16.mxu0 %v1410_v2 }
  0x8a   : > { %1097 = vmatpush3.bf16.msra.mxu0 %v1216_v9 }
  0x8b   : > { %1098 = vmatprep.subr.bf16.mxu0 %v1410_v2 }
  0x8e   : > { %1099 = vmatpush3.bf16.msra.mxu0 %v1217_v10  ;;  %v1057_v10 = vld [vmem:[%s471_s21] ss:$0 sm:$0xff] }
  0x8f   : > { %1100 = vmatprep.subr.bf16.mxu0 %v1410_v2 }
  0x92   : > { %1101 = vmatpush3.bf16.msra.mxu0 %v1218_v11 }
  0x95   : > { %1103 = vmatmul.mubr.bf16.vlgmr.msra.gmra.mrb[0].mxu0 %v525_v13 }
 0x168   : > { %v614_v15 = vpop.f32.mrb[0].mxu0 }
 0x169   : > { %v615_v16 = vadd.f32 %v1035_v14, %v614_v15  ;;  %v1104_v17 = vpop.f32.mrb[1].mxu0 }
 0x16a   : > { %v617_v18 = vpop.f32.mrb[2].mxu0 }
 0x16b   : > { %v620_v19 = vmax.f32 %v615_v16, 0.0  ;;  %v1105_v20 = vpop.f32.mrb[3].mxu0 }
 0x16d   : > { %v621_v21 = vadd.f32 %v620_v19, %v524_v12 }
 0x16f   : > { %622 = vadd.xlane.f32.xlu0 %v621_v21 }
 0x1fc   : > { %v623_v22 = vpop.xlane.xlu0 %622 }
 0x1fd   : > { %v624_v23 = vmul.f32 0.03125, %v623_v22 }
 0x1ff   : > { %v625_v24 = vsub.f32 %v621_v21, %v624_v23 }
 0x201   : > { %v626_v25 = vmul.f32 %v1634_v3, %v625_v24 }
 0x203   : > { %v627_v26 = vmul.f32 %v626_v25, %v626_v25 }
 0x205   : > { %628 = vadd.xlane.f32.xlu0 %v627_v26 }
 0x292   : > { %v629_v27 = vpop.xlane.xlu0 %628 }
 0x293   : > { %v630_v28 = vmul.f32 0.03125, %v629_v27 }
 0x295   : > { %v631_v29 = vadd.f32 1e-05, %v630_v28 }
 0x297   : > { %1227 = vrsqrt.f32 %v631_v29 }
 0x2a1   : > { %v1228_v30 = vpop.eup %1227 }
 0x2a2   : > { %v633_v32 = vmul.f32 %v1228_v30, %v626_v25 }
 0x2a4   : > { %v640_v34 = vmul.f32 %v1044_v31, %v633_v32 }
 0x2a6   : > { %v647_v35 = vadd.f32 %v1045_v33, %v640_v34 }
 0x2a8   : > { %v649_v36 = vpack.c.bf16 %v647_v35, %v647_v35 }
 0x2aa   : > { %650 = vst [vmem:[#allocation3] sm:$0xf] %v649_v36 }
 0x2b1   : > { %v663_v38 = vld [vmem:[#allocation3] sm:$0xf] }
 0x2b2   : > { %v670_v39 = vsel %vm668_vm2, %v663_v38, 0 }
 0x2b3   : > { %1107 = vmatpush3.bf16.msra.mxu1 %v670_v39 }
 0x2b4   : > { %1112 = vmatprep.subr.bf16.mxu1 %v1410_v2 }
 0x2b6   : > { %1109 = vmatmul.mubr.msk.bf16.vlgmr.msra.gmra.mrb[0].mxu1 %vm664_vm3, %v658_v40 }
 0x2b7   : > { %1113 = vmatpush3.bf16.msra.mxu1 %v1219_v41  ;;  %1128 = vmatprep.mubr.msk.bf16.mxu1 %vm1411_vm1, %v1410_v2 }
 0x2b8   : > { %1114 = vmatprep.subr.bf16.mxu1 %v1410_v2 }
 0x2bb   : > { %1115 = vmatpush3.bf16.msra.mxu1 %v1220_v42 }
 0x2bc   : > { %1116 = vmatprep.subr.bf16.mxu1 %v1410_v2 }
 0x2bf   : > { %1117 = vmatpush3.bf16.msra.mxu1 %v1221_v43 }
 0x2c0   : > { %1118 = vmatprep.subr.bf16.mxu1 %v1410_v2 }
 0x2c3   : > { %1119 = vmatpush3.bf16.msra.mxu1 %v1222_v44 }
 0x2c4   : > { %1120 = vmatprep.subr.bf16.mxu1 %v1410_v2 }
 0x2c7   : > { %1121 = vmatpush3.bf16.msra.mxu1 %v1223_v45 }
 0x2c8   : > { %1122 = vmatprep.subr.bf16.mxu1 %v1410_v2 }
 0x2cb   : > { %1123 = vmatpush3.bf16.msra.mxu1 %v1224_v46 }
 0x2cc   : > { %1124 = vmatprep.subr.bf16.mxu1 %v1410_v2 }
 0x2cf   : > { %1125 = vmatpush3.bf16.msra.mxu1 %v1225_v47 }
 0x2d0   : > { %1126 = vmatprep.subr.bf16.mxu1 %v1410_v2 }
 0x2d3   : > { %1127 = vmatpush3.bf16.msra.mxu1 %v1226_v48 }
 0x389   : > { %v706_v49 = vpop.f32.mrb[0].mxu1 }
 0x38a   : > { %v721_v50 = vpack.c.bf16 %v706_v49, %v706_v49  ;;  %v1110_v51 = vpop.f32.mrb[1].mxu1 }
 0x38b   : > { %v709_v52 = vpop.f32.mrb[2].mxu1 }
 0x38c   : > { %v1111_v53 = vpop.f32.mrb[3].mxu1  ;;  %1129 = vmatmul.mubr.bf16.vlgmr.msra.gmra.mrb[4].mxu1 %v721_v50 }
 0x45f   : > { %v827_v55 = vpop.f32.mrb[4].mxu1 }
 0x460   : > { %v828_v56 = vadd.f32 %v1047_v54, %v827_v55  ;;  %v1130_v57 = vpop.f32.mrb[5].mxu1 }
 0x461   : > { %v830_v58 = vpop.f32.mrb[6].mxu1 }
 0x462   : > { %v833_v59 = vmax.f32 %v828_v56, 0.0  ;;  %v1131_v60 = vpop.f32.mrb[7].mxu1 }
 0x464   : > { %v834_v61 = vadd.f32 %v833_v59, %v647_v35 }
 0x466   : > { %837 = vadd.xlane.f32.xlu1 %v834_v61 }
 0x4f3   : > { %v838_v62 = vpop.xlane.xlu1 %837 }
 0x4f4   : > { %v839_v63 = vmul.f32 0.03125, %v838_v62 }
 0x4f6   : > { %v840_v0 = vsub.f32 %v834_v61, %v839_v63 }
 0x4f8   : > { %v841_v1 = vmul.f32 %v1634_v3, %v840_v0 }
 0x4fa   : > { %v842_v2 = vmul.f32 %v841_v1, %v841_v1 }
 0x4fc   : > { %843 = vadd.xlane.f32.xlu1 %v842_v2 }
 0x589   : > { %v844_v4 = vpop.xlane.xlu1 %843 }
 0x58a   : > { %v845_v5 = vmul.f32 0.03125, %v844_v4 }
 0x58c   : > { %v846_v6 = vadd.f32 1e-05, %v845_v5 }
 0x58e   : > { %1229 = vrsqrt.f32 %v846_v6 }
 0x598   : > { %v1230_v7 = vpop.eup %1229 }
 0x599   : > { %v848_v9 = vmul.f32 %v1230_v7, %v841_v1 }
 0x59b   : > { %v855_v3 = vmul.f32 %v1056_v8, %v848_v9 }
 0x59d   : > { %v862_v11 = vadd.f32 %v1057_v10, %v855_v3 }
 0x59f   : > { %864 = vst [vmem:[#allocation11] sm:$0xff] %v862_v11 }
 0x5a0   : > { %1328 = shalt.err (!%p1325_p5)
}
 0x5a1   : > { %s1835_s22 = sld [smem:[#allocation22_spill]] }
 0x5a7   : > { %s1329_s21 = scalar_lea.hbm %s1835_s22, 128 }
 0x5a8   : > { %p1330_p8 = scmp.ne.s32.totalorder %s1835_s22, %s1329_s21  ;;  %p1335_p11 = scmp.lt.u32.totalorder %s1329_s21, %s1835_s22 }
 0x5aa   : > { %p1331_p9 = pnand %p1330_p8, %p1749_p7 }
 0x5ac   : > { %p1332_p10 = pneg %p1331_p9 }
 0x5ae   : > { %p1337_p13 = pnand %p1335_p11, %p1332_p10 }
 0x5b0   : > { %1340 = shalt.err (!%p1337_p13)
}
 0x5b1   : > { %1141 = dma.vmem_to_hbm [thread:$0]  (%p1749_p7), %s1640_s28, 128, %s1835_s22, [#allocation8]  }
 0x5b2   : > { %1378 = dma.done.wait (%p1749_p7), [#allocation8], 128  }
 0x5b3   : > { %1380 = vsyncadd (%p1749_p7), [#allocation8], 4294967168 }
 0x5b4 PF: > { %s25_s18 = sadd.s32 1, %s1403_s18   ;;  %s1836_s13 = smov %s1387_s14 }
 0x5b5   : > { %p22_p2 = scmp.ge.s32.totalorder %s25_s18, 4   ;;  %s1837_s14 = smov %s1391_s15 }
 0x5b6   : > { %s1838_s15 = smov %s1555_s19  ;;  %s1839_s16 = smov %s1399_s17 }
 0x5b7   : > { %s1840_s17 = smov %s1842_s26  ;;  %24 = sbr.rel (!%p22_p2) target bundleno = 10 (0xa), region = 139 }
 0x5be   :  { %885 = vsyncpa [#allocation7], 1 }
 0x5bf   :  { %887 = vsyncpa [#allocation7 + $0x1], 1 }
 0x5c0   :  { %888 = vsyncpa [#allocation10], 1 }
 0x5c1   :  { %890 = vsyncpa [#allocation10 + $0x1], 1 }
 0x5c2   :  { %891 = vsyncpa [#allocation8], 1 }
 0x5c3   :  { %893 = vsyncpa [#allocation8 + $0x1], 1 }
 0x5c4   :  { %894 = vsyncmov [#allocation5] }
 0x5c7   :  { %s895_s28 = vpop.sfrf %894 }
 0x5c8   :  { %p1062_p3 = scmp.ne.s32.totalorder %s895_s28, 0 }
 0x5ca   :  { %899 = shalt.err (%p1062_p3)  }

</bundles_post_ra>
